<compile_context>
chip_gen: v7x
topology: tpu7x:2x2x1
jax: 0.10.0
libtpu: 0.0.40
codegen_flags: <defaults>
</compile_context>

<pallas_src>
import math
import functools

import jax
import jax.numpy as jnp
from jax.experimental import pallas as pl
from jax.experimental.pallas import tpu as pltpu


def _round_up(v, m):
    return ((v + m - 1) // m) * m


def _arc_margin_kernel(x_ref, w_ref, label_ref, out_ref, *,
                       s, cos_m, sin_m, th, mm, easy_margin, matmul_dtype):
    x = x_ref[...]                      # (TM, K)
    w = w_ref[...]                      # (TN, K)

    # 1 / max(||row||, eps) computed as rsqrt(max(||row||^2, eps^2)); eps=1e-12.
    eps2 = jnp.float32(1e-24)
    xf = x.astype(jnp.float32)
    wf = w.astype(jnp.float32)
    inv_xn = jax.lax.rsqrt(
        jnp.maximum(jnp.sum(xf * xf, axis=-1, keepdims=True), eps2))   # (TM, 1)
    inv_wn = jax.lax.rsqrt(
        jnp.maximum(jnp.sum(wf * wf, axis=-1), eps2))                  # (TN,)

    if matmul_dtype is not None:
        x = x.astype(matmul_dtype)
        w = w.astype(matmul_dtype)

    # Contract on the shared last (K) dim directly -- no weight transpose.
    raw = jax.lax.dot_general(
        x, w,
        dimension_numbers=(((1,), (1,)), ((), ())),
        preferred_element_type=jnp.float32)                            # (TM, TN)

    # Normalize after the matmul: cosine = (x @ w^T) / (||x|| * ||w||).
    cosine = raw * inv_xn * inv_wn.reshape(1, -1)

    # One-hot as an iota compare, offset by this tile's class offset.
    tn = out_ref.shape[1]
    labels = label_ref[...]                                            # (TM, 1) int32
    col = jax.lax.broadcasted_iota(jnp.int32, cosine.shape, 1) \
        + pl.program_id(1) * tn
    is_label = col == labels                                           # (TM, TN)

    # Margin math only for the label column of each row (at most one hit per
    # row in this tile; rows whose label falls in another tile get an all-
    # false mask and the phi value is simply never selected).
    cos_l = jnp.sum(jnp.where(is_label, cosine, 0.0),
                    axis=-1, keepdims=True)                            # (TM, 1)
    sin_l = jnp.sqrt(jnp.clip(1.0 - cos_l * cos_l, 0.0, 1.0))
    phi_l = cos_l * cos_m - sin_l * sin_m
    if easy_margin:
        phi_l = jnp.where(cos_l > 0.0, phi_l, cos_l)
    else:
        phi_l = jnp.where(cos_l > th, phi_l, cos_l - mm)

    # Epilogue: one select + one multiply per output element.
    out_ref[...] = (jnp.where(is_label, phi_l, cosine) * s).astype(out_ref.dtype)


def arc_margin_product(x, weight, label, *, s=30.0, m=0.5, easy_margin=False,
                       block_m=256, block_n=512, matmul_dtype=None):
    """ArcFace head forward.

    x:      (B, in_features)  float
    weight: (out_features, in_features) float
    label:  (B,) int
    Returns (B, out_features) float32.

    matmul_dtype: set to jnp.bfloat16 to run the cosine matmul in bf16 with
    f32 accumulation (faster / half the weight bytes; slightly lower cosine
    precision -- validate for your class count).
    """
    B, K = x.shape
    OUT, Kw = weight.shape
    assert K == Kw, "in_features mismatch"

    cos_m = math.cos(m)
    sin_m = math.sin(m)
    th = math.cos(math.pi - m)
    mm = math.sin(math.pi - m) * m

    # Effective tile sizes: respect (8, 128) tiling, clamp to (padded) problem.
    tm = min(block_m, _round_up(B, 8))
    tn = min(block_n, _round_up(OUT, 128))
    Bp = _round_up(B, tm)
    Np = _round_up(OUT, tn)

    # Zero padding is inert: padded weight rows give cosine == 0 and padded
    # batch rows / class columns are sliced off before returning.
    xp = jnp.pad(x, ((0, Bp - B), (0, 0))) if Bp != B else x
    wp = jnp.pad(weight, ((0, Np - OUT), (0, 0))) if Np != OUT else weight
    label2d = jnp.pad(label.astype(jnp.int32), (0, Bp - B)).reshape(Bp, 1)

    kernel = functools.partial(
        _arc_margin_kernel,
        s=float(s), cos_m=cos_m, sin_m=sin_m, th=th, mm=mm,
        easy_margin=easy_margin, matmul_dtype=matmul_dtype)

    out = pl.pallas_call(
        kernel,
        out_shape=jax.ShapeDtypeStruct((Bp, Np), jnp.float32),
        grid=(Bp // tm, Np // tn),
        in_specs=[
            pl.BlockSpec((tm, K), lambda i, j: (i, 0)),   # x tile
            pl.BlockSpec((tn, K), lambda i, j: (j, 0)),   # weight tile
            pl.BlockSpec((tm, 1), lambda i, j: (i, 0)),   # labels
        ],
        out_specs=pl.BlockSpec((tm, tn), lambda i, j: (i, j)),
        compiler_params=pltpu.CompilerParams(
            dimension_semantics=("parallel", "parallel")),
    )(xp, wp, label2d)

    return out[:B, :OUT]


def _reference(x, weight, label, *, s=30.0, m=0.5, easy_margin=False):
    # Pure-JAX reference mirroring the PyTorch forward.
    eps = 1e-12
    x_n = x / jnp.maximum(jnp.linalg.norm(x, axis=1, keepdims=True), eps)
    w_n = weight / jnp.maximum(jnp.linalg.norm(weight, axis=1, keepdims=True), eps)
    cosine = x_n @ w_n.T
    sine = jnp.sqrt(jnp.clip(1.0 - cosine ** 2, 0.0, 1.0))
    phi = cosine * math.cos(m) - sine * math.sin(m)
    if easy_margin:
        phi = jnp.where(cosine > 0, phi, cosine)
    else:
        phi = jnp.where(cosine > math.cos(math.pi - m),
                        phi, cosine - math.sin(math.pi - m) * m)
    one_hot = jax.nn.one_hot(label, cosine.shape[1], dtype=cosine.dtype)
    return (one_hot * phi + (1.0 - one_hot) * cosine) * s


if __name__ == "__main__":
    B = 8
    IN_FEATURES = 32
    OUT_FEATURES = 16

    key = jax.random.PRNGKey(0)
    kx, kw, kl = jax.random.split(key, 3)

    x = jax.random.normal(kx, (B, IN_FEATURES), dtype=jnp.float32)

    # nn.init.xavier_uniform_ on a (out_features, in_features) weight:
    bound = math.sqrt(6.0 / (IN_FEATURES + OUT_FEATURES))
    weight = jax.random.uniform(
        kw, (OUT_FEATURES, IN_FEATURES), dtype=jnp.float32,
        minval=-bound, maxval=bound)

    label = jax.random.randint(kl, (B,), 0, OUT_FEATURES, dtype=jnp.int32)

    out = arc_margin_product(x, weight, label, s=30.0, m=0.5, easy_margin=False)
    out = jax.block_until_ready(out)

    ref = _reference(x, weight, label, s=30.0, m=0.5, easy_margin=False)
    assert out.shape == (B, OUT_FEATURES)
    assert jnp.allclose(out, ref, atol=1e-4, rtol=1e-4)

    # Also exercise the easy-margin branch once.
    out_em = jax.block_until_ready(
        arc_margin_product(x, weight, label, s=30.0, m=0.5, easy_margin=True))
    ref_em = _reference(x, weight, label, s=30.0, m=0.5, easy_margin=True)
    assert jnp.allclose(out_em, ref_em, atol=1e-4, rtol=1e-4)

    print("KERNEL_OK")
</pallas_src>

<mosaic_0001>
module attributes {stable_mosaic.version = 11 : i64} {
  func.func @_arc_margin_kernel(%arg0: i32, %arg1: i32, %arg2: memref<8x32xf32, #tpu.memory_space<vmem>>, %arg3: memref<128x32xf32, #tpu.memory_space<vmem>>, %arg4: memref<8x1xi32, #tpu.memory_space<vmem>>, %arg5: memref<8x128xf32, #tpu.memory_space<vmem>>) attributes {dimension_semantics = [#tpu.dimension_semantics<parallel>, #tpu.dimension_semantics<parallel>], iteration_bounds = array<i64: 1, 1>, scalar_prefetch = 0 : i64, scratch_operands = 0 : i64, tpu.core_type = #tpu.core_type<tc>, window_params = [{transform_indices = @transform_0, window_bounds = array<i64: 8, 32>}, {transform_indices = @transform_1, window_bounds = array<i64: 128, 32>}, {transform_indices = @transform_2, window_bounds = array<i64: 8, 1>}, {transform_indices = @transform_3, window_bounds = array<i64: 8, 128>}]} {
    %c0 = arith.constant 0 : index
    %c0_0 = arith.constant 0 : index
    %0 = vector.load %arg2[%c0, %c0_0] : memref<8x32xf32, #tpu.memory_space<vmem>>, vector<8x32xf32>
    %c0_1 = arith.constant 0 : index
    %c0_2 = arith.constant 0 : index
    %1 = vector.load %arg3[%c0_1, %c0_2] : memref<128x32xf32, #tpu.memory_space<vmem>>, vector<128x32xf32>
    %2 = arith.mulf %0, %0 : vector<8x32xf32>
    %cst = arith.constant dense<0.000000e+00> : vector<8xf32>
    %3 = vector.multi_reduction <add>, %2, %cst [1] : vector<8x32xf32> to vector<8xf32>
    %4 = vector.shape_cast %3 : vector<8xf32> to vector<8x1xf32>
    %cst_3 = arith.constant 1.000000e-24 : f32
    %5 = vector.broadcast %cst_3 : f32 to vector<8x1xf32>
    %6 = arith.maximumf %4, %5 : vector<8x1xf32>
    %7 = math.rsqrt %6 : vector<8x1xf32>
    %8 = arith.mulf %1, %1 : vector<128x32xf32>
    %cst_4 = arith.constant dense<0.000000e+00> : vector<128xf32>
    %9 = vector.multi_reduction <add>, %8, %cst_4 [1] : vector<128x32xf32> to vector<128xf32>
    %cst_5 = arith.constant 1.000000e-24 : f32
    %10 = vector.broadcast %cst_5 : f32 to vector<128xf32>
    %11 = arith.maximumf %9, %10 : vector<128xf32>
    %12 = math.rsqrt %11 : vector<128xf32>
    %cst_6 = arith.constant dense<0.000000e+00> : vector<8x128xf32>
    %13 = tpu.matmul %0, %1, %cst_6 {dimension_numbers = #tpu.dot_dimension_numbers<[1], [1], [0], [0], [0, 0, 1, 0], [], []>} : vector<8x32xf32>, vector<128x32xf32>, vector<8x128xf32> -> vector<8x128xf32>
    %14 = vector.broadcast %7 : vector<8x1xf32> to vector<8x128xf32>
    %15 = arith.mulf %13, %14 : vector<8x128xf32>
    %16 = vector.shape_cast %12 : vector<128xf32> to vector<1x128xf32>
    %17 = vector.broadcast %16 : vector<1x128xf32> to vector<8x128xf32>
    %18 = arith.mulf %15, %17 : vector<8x128xf32>
    %c0_7 = arith.constant 0 : index
    %c0_8 = arith.constant 0 : index
    %19 = vector.load %arg4[%c0_7, %c0_8] : memref<8x1xi32, #tpu.memory_space<vmem>>, vector<8x1xi32>
    %20 = tpu.iota {dimensions = array<i32: 1>} : vector<8x128xi32>
    %c128_i32 = arith.constant 128 : i32
    %21 = arith.muli %arg1, %c128_i32 : i32
    %22 = vector.broadcast %21 : i32 to vector<8x128xi32>
    %23 = arith.addi %20, %22 : vector<8x128xi32>
    %24 = vector.broadcast %19 : vector<8x1xi32> to vector<8x128xi32>
    %25 = arith.cmpi eq, %23, %24 : vector<8x128xi32>
    %cst_9 = arith.constant 0.000000e+00 : f32
    %26 = vector.broadcast %cst_9 : f32 to vector<8x128xf32>
    %27 = arith.select %25, %18, %26 : vector<8x128xi1>, vector<8x128xf32>
    %cst_10 = arith.constant dense<0.000000e+00> : vector<8xf32>
    %28 = vector.multi_reduction <add>, %27, %cst_10 [1] : vector<8x128xf32> to vector<8xf32>
    %29 = vector.shape_cast %28 : vector<8xf32> to vector<8x1xf32>
    %30 = arith.mulf %29, %29 : vector<8x1xf32>
    %cst_11 = arith.constant 1.000000e+00 : f32
    %31 = vector.broadcast %cst_11 : f32 to vector<8x1xf32>
    %32 = arith.subf %31, %30 : vector<8x1xf32>
    %cst_12 = arith.constant 0.000000e+00 : f32
    %cst_13 = arith.constant 1.000000e+00 : f32
    %33 = vector.broadcast %cst_12 : f32 to vector<8x1xf32>
    %34 = arith.maximumf %33, %32 : vector<8x1xf32>
    %35 = vector.broadcast %cst_13 : f32 to vector<8x1xf32>
    %36 = arith.minimumf %35, %34 : vector<8x1xf32>
    %37 = math.sqrt %36 : vector<8x1xf32>
    %cst_14 = arith.constant 0.87758255 : f32
    %38 = vector.broadcast %cst_14 : f32 to vector<8x1xf32>
    %39 = arith.mulf %29, %38 : vector<8x1xf32>
    %cst_15 = arith.constant 0.47942555 : f32
    %40 = vector.broadcast %cst_15 : f32 to vector<8x1xf32>
    %41 = arith.mulf %37, %40 : vector<8x1xf32>
    %42 = arith.subf %39, %41 : vector<8x1xf32>
    %cst_16 = arith.constant -0.87758255 : f32
    %43 = vector.broadcast %cst_16 : f32 to vector<8x1xf32>
    %44 = arith.cmpf ogt, %29, %43 : vector<8x1xf32>
    %cst_17 = arith.constant 0.239712775 : f32
    %45 = vector.broadcast %cst_17 : f32 to vector<8x1xf32>
    %46 = arith.subf %29, %45 : vector<8x1xf32>
    %47 = arith.select %44, %42, %46 : vector<8x1xi1>, vector<8x1xf32>
    %48 = vector.shape_cast %47 : vector<8x1xf32> to vector<8x1xf32>
    %49 = vector.broadcast %48 : vector<8x1xf32> to vector<8x128xf32>
    %50 = arith.select %25, %49, %18 : vector<8x128xi1>, vector<8x128xf32>
    %cst_18 = arith.constant 3.000000e+01 : f32
    %51 = vector.broadcast %cst_18 : f32 to vector<8x128xf32>
    %52 = arith.mulf %50, %51 : vector<8x128xf32>
    %c0_19 = arith.constant 0 : index
    %c0_20 = arith.constant 0 : index
    %53 = vector.load %arg5[%c0_19, %c0_20] : memref<8x128xf32, #tpu.memory_space<vmem>>, vector<8x128xf32>
    tpu.vector_store %arg5[%c0_19, %c0_20], %52 {strides = array<i32>} : memref<8x128xf32, #tpu.memory_space<vmem>>, vector<8x128xf32>,
    return
  }
  func.func @transform_0(%arg0: i32, %arg1: i32) -> (i32, i32) {
    %c0_i32 = arith.constant 0 : i32
    %c0_i32_0 = arith.constant 0 : i32
    return %arg0, %c0_i32 : i32, i32
  }
  func.func @transform_1(%arg0: i32, %arg1: i32) -> (i32, i32) {
    %c0_i32 = arith.constant 0 : i32
    %c0_i32_0 = arith.constant 0 : i32
    return %arg1, %c0_i32 : i32, i32
  }
  func.func @transform_2(%arg0: i32, %arg1: i32) -> (i32, i32) {
    %c0_i32 = arith.constant 0 : i32
    %c0_i32_0 = arith.constant 0 : i32
    return %arg0, %c0_i32 : i32, i32
  }
  func.func @transform_3(%arg0: i32, %arg1: i32) -> (i32, i32) {
    %c0_i32 = arith.constant 0 : i32
    return %arg0, %arg1 : i32, i32
  }
}

</mosaic_0001>

<bundles_post_ra>
// kernel: tpu_custom_call.1
= control target key start
LH: loop header
LB: loop body
LE: loop exit
PB: predicated region body
PF: predicated region fallthrough
CT: control target
= control target key end

     0   :  { %vm33_vm0 = vcmask 261120   ;;  %v612_v3 = vmov 0.0|0.0   ;;  %vm613_vm2 = vmmov 0   ;;  %v614_v9 = vmov 0.0   ;;  %s792_s0 = inlined_call_operand.vmem [shape: f32[8,32], index: 0, kind: input, shape index: {}]   ;;  %s793_s1 = inlined_call_operand.vmem [shape: f32[128,32], index: 1, kind: input, shape index: {}]   ;;  %s794_s2 = inlined_call_operand.vmem [shape: s32[8,1], index: 2, kind: input, shape index: {}]   ;;  %s795_s3 = inlined_call_operand.hbm [shape: f32[8,128], index: 3, kind: output, shape index: {}]  }
   0x1   :  { %v16_v0 = vld [vmem:[%s793_s1] sm:$0xff]  ;;  %v17_v1 = vld [vmem:[%s793_s1 + $0x8] sm:$0xff]  ;;  %v18_v2 = vld [vmem:[%s793_s1 + $0x10] sm:$0xff]  ;;  %513 = vmatprep.subr.bf16.mxu0 %v612_v3  ;;  %510 = vmatprep.mubr.msk.f32.mxu0 %vm613_vm2, %v614_v9 }
   0x2   :  { %v514_v4 = vpack.c.bf16 %v17_v1, %v16_v0  ;;  %vm649_vm1 = vmpackc.low %vm33_vm0, %vm33_vm0  ;;  %v19_v6 = vld [vmem:[%s793_s1 + $0x18] sm:$0xff]  ;;  %v39_v7 = vmul.f32 %v16_v0, %v16_v0  ;;  %v41_v8 = vmul.f32 %v18_v2, %v18_v2  ;;  %v40_v10 = vmul.f32 %v17_v1, %v17_v1  ;;  %v20_v14 = vld [vmem:[%s793_s1 + $0x20] sm:$0xff] }
   0x3   :  { %v42_v11 = vmul.f32 %v19_v6, %v19_v6  ;;  %v21_v15 = vld [vmem:[%s793_s1 + $0x28] sm:$0xff]  ;;  %v43_v17 = vmul.f32 %v20_v14, %v20_v14 }
   0x4   :  { %516 = vmatpush3.bf16.xpose.msk.msra.mxu0 %vm649_vm1, %v514_v4  ;;  %v55_v12 = vsel %vm33_vm0, %v39_v7, 0.0  ;;  %v61_v13 = vsel %vm33_vm0, %v41_v8, 0.0  ;;  %v58_v16 = vsel %vm33_vm0, %v40_v10, 0.0  ;;  %v44_v19 = vmul.f32 %v21_v15, %v21_v15 }
   0x5   :  { %517 = vmatprep.subr.bf16.mxu0 %v612_v3  ;;  %56 = vadd.xlane.f32.xlu0 %v55_v12  ;;  %v64_v18 = vsel %vm33_vm0, %v42_v11, 0.0 }
   0x6   :  { %62 = vadd.xlane.f32.xlu1 %v61_v13 }
   0x7   :  { %8 = vsyncpa [#allocation3], 0  ;;  %v518_v20 = vpack.c.bf16 %v19_v6, %v18_v2  ;;  %v22_v21 = vld [vmem:[%s793_s1 + $0x30] sm:$0xff]  ;;  %v23_v22 = vld [vmem:[%s793_s1 + $0x38] sm:$0xff]  ;;  %v67_v23 = vsel %vm33_vm0, %v43_v17, 0.0  ;;  %v70_v25 = vsel %vm33_vm0, %v44_v19, 0.0  ;;  %v522_v34 = vpack.c.bf16 %v21_v15, %v20_v14 }
   0x8   :  { %v45_v24 = vmul.f32 %v22_v21, %v22_v21  ;;  %v46_v26 = vmul.f32 %v23_v22, %v23_v22  ;;  %v615_v27 = vmov 0   ;;  %v24_v28 = vld [vmem:[%s793_s1 + $0x40] sm:$0xff]  ;;  %v25_v29 = vld [vmem:[%s793_s1 + $0x48] sm:$0xff]  ;;  %v26_v35 = vld [vmem:[%s793_s1 + $0x50] sm:$0xff]  ;;  %v526_v47 = vpack.c.bf16 %v23_v22, %v22_v21 }
   0x9   :  { %59 = vadd.xlane.f32.xlu0 %v58_v16  ;;  %550 = vset.pattern.permute.xlu1 %v615_v27  ;;  %v47_v31 = vmul.f32 %v24_v28, %v24_v28  ;;  %v48_v33 = vmul.f32 %v25_v29, %v25_v29  ;;  %v27_v36 = vld [vmem:[%s793_s1 + $0x58] sm:$0xff]  ;;  %v49_v38 = vmul.f32 %v26_v35, %v26_v35  ;;  %v28_v41 = vld [vmem:[%s793_s1 + $0x60] sm:$0xff]  ;;  %v29_v42 = vld [vmem:[%s793_s1 + $0x68] sm:$0xff]  ;;  %v273_v7 = vlaneseq }
   0xa   :  { %65 = vadd.xlane.f32.xlu1 %v64_v18  ;;  %v73_v30 = vsel %vm33_vm0, %v45_v24, 0.0  ;;  %551 = vset.pattern.permute.xlu0 %v615_v27  ;;  %v76_v32 = vsel %vm33_vm0, %v46_v26, 0.0  ;;  %v50_v40 = vmul.f32 %v27_v36, %v27_v36  ;;  %v51_v44 = vmul.f32 %v28_v41, %v28_v41  ;;  %v30_v48 = vld [vmem:[%s793_s1 + $0x70] sm:$0xff]  ;;  %v31_v49 = vld [vmem:[%s793_s1 + $0x78] sm:$0xff]  ;;  %v15_v54 = vld [vmem:[%s792_s0] sm:$0xff] }
   0xb   :  { %v79_v37 = vsel %vm33_vm0, %v47_v31, 0.0  ;;  %v82_v39 = vsel %vm33_vm0, %v48_v33, 0.0  ;;  %v85_v43 = vsel %vm33_vm0, %v49_v38, 0.0  ;;  %v52_v46 = vmul.f32 %v29_v42, %v29_v42  ;;  %v398_v62 = vld [vmem:[%s794_s2] sm:$0xff]  ;;  %s616_s2 = smov [#allocation2]  }
   0xc   :  { %520 = vmatpush3.bf16.xpose.msk.msra.mxu0 %vm649_vm1, %v518_v20  ;;  %v88_v45 = vsel %vm33_vm0, %v50_v40, 0.0  ;;  %v91_v50 = vsel %vm33_vm0, %v51_v44, 0.0  ;;  %v53_v51 = vmul.f32 %v30_v48, %v30_v48  ;;  %v54_v53 = vmul.f32 %v31_v49, %v31_v49  ;;  %s435_s19 = sshll.u32 %s616_s2, 4  ;;  %s436_s19 = int_to_ptr.vmem [resolvable:$true] %s435_s19 }
   0xd   :  { %521 = vmatprep.subr.bf16.mxu0 %v612_v3  ;;  %68 = vadd.xlane.f32.xlu0 %v67_v23  ;;  %v94_v52 = vsel %vm33_vm0, %v52_v46, 0.0  ;;  %v32_v56 = vmul.f32 %v15_v54, %v15_v54  ;;  %v530_v58 = vpack.c.bf16 %v25_v29, %v24_v28  ;;  %v534_v60 = vpack.c.bf16 %v27_v36, %v26_v35  ;;  %s588_s20 = scalar_lea.vmem %s436_s19, 128  ;;  %p593_p1 = scmp.lt.s32.totalorder %s436_s19, %s436_s19 }
   0xe   :  { %71 = vadd.xlane.f32.xlu1 %v70_v25  ;;  %v97_v55 = vsel %vm33_vm0, %v53_v51, 0.0  ;;  %v100_v57 = vsel %vm33_vm0, %v54_v53, 0.0  ;;  %v538_v61 = vpack.c.bf16 %v29_v42, %v28_v41  ;;  %v542_v63 = vpack.c.bf16 %v31_v49, %v30_v48  ;;  %p589_p0 = scmp.ne.s32.totalorder %s436_s19, %s588_s20  ;;  %p594_p2 = scmp.lt.s32.totalorder %s588_s20, %s588_s20 }
   0xf   :  { %v34_v59 = vsel %vm33_vm0, %v32_v56, 0.0  ;;  %v739_v10 = vand.u32 127, %v273_v7  ;;  %v741_v12 = vshrl.u32 %v273_v7, 7  ;;  %vm284_vm3 = vcmask 130112  }
  0x10   :  { %vm291_vm4 = vcmask 195712   ;;  %vm298_vm5 = vcmask 261312   ;;  %vm305_vm6 = vcmask 326912   ;;  %vm312_vm7 = vcmask 392512   ;;  %p595_p3 = por %p594_p2, %p593_p1 }
  0x11   :  { %74 = vadd.xlane.f32.xlu0 %v73_v30  ;;  %v279_v5 = vadd.s32 4294967288, %v739_v10  ;;  %v286_v15 = vadd.s32 4294967280, %v739_v10  ;;  %v277_v19 = vsub.s32 %v739_v10, %v741_v12  ;;  %v293_v22 = vadd.s32 4294967272, %v739_v10 }
  0x12   :  { %77 = vadd.xlane.f32.xlu1 %v76_v32  ;;  %v300_v29 = vadd.s32 4294967264, %v739_v10  ;;  %v307_v36 = vadd.s32 4294967256, %v739_v10  ;;  %vm319_vm8 = vcmask 458112   ;;  %vm326_vm9 = vcmask 523712   ;;  %p596_p4 = pnand %p595_p3, %p589_p0 }
  0x13   :  { %v282_v20 = vsub.s32 %v279_v5, %v741_v12  ;;  %v289_v25 = vsub.s32 %v286_v15, %v741_v12  ;;  %v296_v32 = vsub.s32 %v293_v22, %v741_v12  ;;  %vm333_vm10 = vcmask 589312  }
  0x14   :  { %524 = vmatpush3.bf16.xpose.msk.msra.mxu0 %vm649_vm1, %v522_v34  ;;  %v310_v46 = vsub.s32 %v307_v36, %v741_v12  ;;  %vm340_vm11 = vcmask 654912   ;;  %vm347_vm12 = vcmask 720512   ;;  %vm354_vm13 = vcmask 786112  }
  0x15   :  { %525 = vmatprep.subr.bf16.mxu0 %v612_v3  ;;  %80 = vadd.xlane.f32.xlu0 %v79_v37  ;;  %v370_v36 = vadd.s32 4294967184, %v739_v10  ;;  %vm361_vm14 = vcmask 851712   ;;  %vm368_vm15 = vcmask 917312  }
  0x16   :  { %83 = vadd.xlane.f32.xlu1 %v82_v39  ;;  %v303_v39 = vsub.s32 %v300_v29, %v741_v12 }
  0x19   :  { %86 = vadd.xlane.f32.xlu0 %v85_v43  ;;  %v314_v43 = vadd.s32 4294967248, %v739_v10 }
  0x1a   :  { %89 = vadd.xlane.f32.xlu1 %v88_v45 }
  0x1b   :  { %v317_v53 = vsub.s32 %v314_v43, %v741_v12 }
  0x1c   :  { %528 = vmatpush3.bf16.xpose.msk.msra.mxu0 %vm649_vm1, %v526_v47 }
  0x1d   :  { %529 = vmatprep.subr.bf16.mxu0 %v612_v3  ;;  %92 = vadd.xlane.f32.xlu0 %v91_v50  ;;  %v321_v50 = vadd.s32 4294967240, %v739_v10 }
  0x1e   :  { %95 = vadd.xlane.f32.xlu1 %v94_v52 }
  0x21   :  { %98 = vadd.xlane.f32.xlu0 %v97_v55 }
  0x22   :  { %101 = vadd.xlane.f32.xlu1 %v100_v57  ;;  %v328_v57 = vadd.s32 4294967232, %v739_v10 }
  0x24   :  { %532 = vmatpush3.bf16.xpose.msk.msra.mxu0 %vm649_vm1, %v530_v58 }
  0x25   :  { %533 = vmatprep.subr.bf16.mxu0 %v612_v3  ;;  %35 = vadd.xlane.f32.xlu0 %v34_v59 }
  0x2c   :  { %536 = vmatpush3.bf16.xpose.msk.msra.mxu0 %vm649_vm1, %v534_v60  ;;  %v324_v60 = vsub.s32 %v321_v50, %v741_v12 }
  0x2d   :  { %537 = vmatprep.subr.bf16.mxu0 %v612_v3 }
  0x33   :  { %403 = vperm.xlu1 %550, %v398_v62  }
  0x34   :  { %540 = vmatpush3.bf16.xpose.msk.msra.mxu0 %vm649_vm1, %v538_v61 }
  0x35   :  { %541 = vmatprep.subr.bf16.mxu0 %v612_v3 }
  0x3c   :  { %544 = vmatpush3.bf16.xpose.msk.msra.mxu0 %vm649_vm1, %v542_v63  ;;  %vm382_vm1 = vcmask 1048512  }
  0x43   :  { %511 = vmatmul.mubr.msk.f32.vlgmr.msra.gmra.mrb[0].mxu0 %vm33_vm0, %v15_v54  ;;  %vm375_vm0 = vcmask 982912  }
  0x92   :  { %v57_v0 = vpop.xlane.xlu0 %56 }
  0x93   :  { %v63_v1 = vpop.xlane.xlu1 %62  ;;  %v103_v2 = vmax.f32 %v57_v0, 1e-24  ;;  %v335_v0 = vadd.s32 4294967224, %v739_v10 }
  0x94   :  { %v105_v8 = vmax.f32 %v63_v1, 1e-24 }
  0x95   :  { %552 = vrsqrt.f32 %v103_v2  ;;  %v338_v5 = vsub.s32 %v335_v0, %v741_v12 }
  0x96   :  { %v60_v4 = vpop.xlane.xlu0 %59 }
  0x97   :  { %v104_v6 = vmax.f32 %v60_v4, 1e-24  ;;  %v66_v9 = vpop.xlane.xlu1 %65  ;;  %v331_v4 = vsub.s32 %v328_v57, %v741_v12 }
  0x98   :  { %v106_v11 = vmax.f32 %v66_v9, 1e-24  ;;  %v342_v9 = vadd.s32 4294967216, %v739_v10 }
  0x99   :  { %554 = vrsqrt.f32 %v104_v6 }
  0x9a   :  { %v69_v3 = vpop.xlane.xlu0 %68  ;;  %556 = vrsqrt.f32 %v105_v8 }
  0x9b   :  { %v107_v13 = vmax.f32 %v69_v3, 1e-24  ;;  %v72_v14 = vpop.xlane.xlu1 %71  ;;  %558 = vrsqrt.f32 %v106_v11 }
  0x9c   :  { %v108_v16 = vmax.f32 %v72_v14, 1e-24 }
  0x9d   :  { %560 = vrsqrt.f32 %v107_v13 }
  0x9e   :  { %v75_v17 = vpop.xlane.xlu0 %74  ;;  %562 = vrsqrt.f32 %v108_v16  ;;  %v349_v16 = vadd.s32 4294967208, %v739_v10 }
  0x9f   :  { %v553_v18 = vpop.eup %552  ;;  %v109_v23 = vmax.f32 %v75_v17, 1e-24  ;;  %v78_v24 = vpop.xlane.xlu1 %77 }
  0xa0   :  { %v278_v27 = vrot.slane %v553_v18, %v277_v19  ;;  %v110_v30 = vmax.f32 %v78_v24, 1e-24  ;;  %v345_v19 = vsub.s32 %v342_v9, %v741_v12 }
  0xa1   :  { %564 = vrsqrt.f32 %v109_v23  ;;  %v356_v23 = vadd.s32 4294967200, %v739_v10 }
  0xa2   :  { %v81_v31 = vpop.xlane.xlu0 %80  ;;  %566 = vrsqrt.f32 %v110_v30  ;;  %v363_v30 = vadd.s32 4294967192, %v739_v10 }
  0xa3   :  { %v555_v21 = vpop.eup %554  ;;  %v111_v37 = vmax.f32 %v81_v31, 1e-24  ;;  %v84_v38 = vpop.xlane.xlu1 %83 }
  0xa4   :  { %v557_v26 = vpop.eup %556  ;;  %v283_v28 = vrot.slane %v555_v21, %v282_v20  ;;  %v112_v44 = vmax.f32 %v84_v38, 1e-24 }
  0xa5   :  { %v559_v33 = vpop.eup %558  ;;  %v290_v34 = vrot.slane %v557_v26, %v289_v25  ;;  %568 = vrsqrt.f32 %v111_v37  ;;  %v352_v26 = vsub.s32 %v349_v16, %v741_v12  ;;  %v366_v37 = vsub.s32 %v363_v30, %v741_v12 }
  0xa6   :  { %v285_v35 = vsel %vm284_vm3, %v283_v28, %v278_v27  ;;  %v297_v41 = vrot.slane %v559_v33, %v296_v32  ;;  %v87_v45 = vpop.xlane.xlu0 %86  ;;  %570 = vrsqrt.f32 %v112_v44  ;;  %v359_v32 = vsub.s32 %v356_v23, %v741_v12 }
  0xa7   :  { %v561_v40 = vpop.eup %560  ;;  %v292_v42 = vsel %vm291_vm4, %v290_v34, %v285_v35  ;;  %v113_v51 = vmax.f32 %v87_v45, 1e-24  ;;  %v90_v52 = vpop.xlane.xlu1 %89 }
  0xa8   :  { %v563_v47 = vpop.eup %562  ;;  %v304_v48 = vrot.slane %v561_v40, %v303_v39  ;;  %v299_v49 = vsel %vm298_vm5, %v297_v41, %v292_v42  ;;  %v114_v58 = vmax.f32 %v90_v52, 1e-24  ;;  %v377_v41 = vadd.s32 4294967176, %v739_v10 }
  0xa9   :  { %v311_v55 = vrot.slane %v563_v47, %v310_v46  ;;  %572 = vrsqrt.f32 %v113_v51  ;;  %v373_v42 = vsub.s32 %v370_v36, %v741_v12 }
  0xaa   :  { %v306_v56 = vsel %vm305_vm6, %v304_v48, %v299_v49  ;;  %v93_v59 = vpop.xlane.xlu0 %92  ;;  %574 = vrsqrt.f32 %v114_v58  ;;  %v380_v46 = vsub.s32 %v377_v41, %v741_v12 }
  0xab   :  { %v565_v54 = vpop.eup %564  ;;  %v313_v63 = vsel %vm312_vm7, %v311_v55, %v306_v56  ;;  %v115_v1 = vmax.f32 %v93_v59, 1e-24  ;;  %v96_v2 = vpop.xlane.xlu1 %95 }
  0xac   :  { %v567_v61 = vpop.eup %566  ;;  %v318_v62 = vrot.slane %v565_v54, %v317_v53  ;;  %v116_v11 = vmax.f32 %v96_v2, 1e-24 }
  0xad   :  { %v325_v7 = vrot.slane %v567_v61, %v324_v60  ;;  %576 = vrsqrt.f32 %v115_v1 }
  0xae   :  { %v320_v8 = vsel %vm319_vm8, %v318_v62, %v313_v63  ;;  %v99_v3 = vpop.xlane.xlu0 %98  ;;  %578 = vrsqrt.f32 %v116_v11 }
  0xaf   :  { %v569_v6 = vpop.eup %568  ;;  %v327_v15 = vsel %vm326_vm9, %v325_v7, %v320_v8  ;;  %v117_v17 = vmax.f32 %v99_v3, 1e-24  ;;  %v102_v18 = vpop.xlane.xlu1 %101 }
  0xb0   :  { %v571_v13 = vpop.eup %570  ;;  %v332_v14 = vrot.slane %v569_v6, %v331_v4  ;;  %v118_v24 = vmax.f32 %v102_v18, 1e-24 }
  0xb1   :  { %v339_v21 = vrot.slane %v571_v13, %v338_v5  ;;  %580 = vrsqrt.f32 %v117_v17 }
  0xb2   :  { %v334_v22 = vsel %vm333_vm10, %v332_v14, %v327_v15  ;;  %v36_v25 = vpop.xlane.xlu0 %35  ;;  %582 = vrsqrt.f32 %v118_v24 }
  0xb3   :  { %v573_v20 = vpop.eup %572  ;;  %v341_v29 = vsel %vm340_vm11, %v339_v21, %v334_v22  ;;  %v37_v31 = vmax.f32 %v36_v25, 1e-24  ;;  %v404_v52 = vpop.permute.xlu1 %403 }
  0xb4   :  { %v575_v27 = vpop.eup %574  ;;  %v346_v28 = vrot.slane %v573_v20, %v345_v19  ;;  %vm405_vm2 = vcmp.eq.s32.totalorder %v739_v10, %v404_v52 }
  0xb5   :  { %v353_v34 = vrot.slane %v575_v27, %v352_v26  ;;  %584 = vrsqrt.f32 %v37_v31 }
  0xb6   :  { %v348_v35 = vsel %vm347_vm12, %v346_v28, %v341_v29 }
  0xb7   :  { %v577_v33 = vpop.eup %576  ;;  %v355_v40 = vsel %vm354_vm13, %v353_v34, %v348_v35 }
  0xb8   :  { %v579_v38 = vpop.eup %578  ;;  %v360_v39 = vrot.slane %v577_v33, %v359_v32 }
  0xb9   :  { %v367_v44 = vrot.slane %v579_v38, %v366_v37 }
  0xba   :  { %v362_v45 = vsel %vm361_vm14, %v360_v39, %v355_v40 }
  0xbb   :  { %v581_v43 = vpop.eup %580  ;;  %v369_v49 = vsel %vm368_vm15, %v367_v44, %v362_v45 }
  0xbc   :  { %v583_v47 = vpop.eup %582  ;;  %v374_v48 = vrot.slane %v581_v43, %v373_v42 }
  0xbd   :  { %v381_v51 = vrot.slane %v583_v47, %v380_v46 }
  0xbe   :  { %v376_v53 = vsel %vm375_vm0, %v374_v48, %v369_v49 }
  0xbf   :  { %v585_v50 = vpop.eup %584  ;;  %v383_v57 = vsel %vm382_vm1, %v381_v51, %v376_v53 }
 0x116   :  { %v252_v54 = vpop.f32.mrb[0].mxu0 }
 0x117   :  { %v256_v55 = vmul.f32 %v585_v50, %v252_v54  ;;  %v512_v56 = vpop.f32.mrb[1].mxu0 }
 0x119   :  { %v397_v58 = vmul.f32 %v383_v57, %v256_v55 }
 0x11b   :  { %v406_v59 = vsel %vm405_vm2, %v397_v58, 0.0 }
 0x11c   :  { %407 = vadd.xlane.f32.xlu0 %v406_v59 }
 0x1a9   :  { %v408_v12 = vpop.xlane.xlu0 %407 }
 0x1aa   :  { %v409_v60 = vmul.f32 %v408_v12, %v408_v12  ;;  %v420_v7 = vmul.f32 0.87758255, %v408_v12  ;;  %v460_v11 = vadd.f32 -0.23971277, %v408_v12  ;;  %vm423_vm5 = vcmp.gt.f32.partialorder %v408_v12, -0.87758255 }
 0x1ac   :  { %v410_v61 = vsub.f32 1.0, %v409_v60 }
 0x1ae   :  { %v411_v62 = vmax.f32 %v410_v61, 0.0 }
 0x1b0   :  { %v412_v63 = vmin.f32 %v411_v62, 1.0 }
 0x1b2   :  { %586 = vrsqrt.f32 %v412_v63  ;;  %vm415_vm3 = vcmp.eq.f32.partialorder %v412_v63, inf  ;;  %v418_v2 = vand.u32 2147483648, %v412_v63  ;;  %vm417_vm4 = vcmp.eq.f32.partialorder %v412_v63, 0.0 }
 0x1bc   :  { %v587_v0 = vpop.eup %586 }
 0x1bd   :  { %v414_v1 = vmul.f32 %v587_v0, %v412_v63 }
 0x1bf   :  { %v416_v4 = vsel %vm415_vm3, %v412_v63, %v414_v1 }
 0x1c0   :  { %v419_v6 = vsel %vm417_vm4, %v418_v2, %v416_v4 }
 0x1c1   :  { %v421_v8 = vmul.f32 0.47942555, %v419_v6 }
 0x1c3   :  { %v422_v9 = vsub.f32 %v420_v7, %v421_v8 }
 0x1c5   :  { %v425_v3 = vsel %vm423_vm5, %v422_v9, %v460_v11 }
 0x1c6   :  { %v426_v5 = vsel %vm405_vm2, %v425_v3, %v397_v58 }
 0x1c7   :  { %v427_v13 = vmul.f32 30.0, %v426_v5 }
 0x1c9   :  { %428 = vst [vmem:[#allocation2] sm:$0xff] %v427_v13 }
 0x1ca   :  { %599 = shalt.err (!%p596_p4)
}
 0x1cb   :  { %s600_s23 = scalar_lea.hbm %s795_s3, 128 }
 0x1cc   :  { %p601_p5 = scmp.ne.s32.totalorder %s795_s3, %s600_s23  ;;  %p604_p6 = scmp.lt.u32.totalorder %s600_s23, %s795_s3 }
 0x1ce   :  { %p606_p7 = pnand %p604_p6, %p601_p5 }
 0x1d0   :  { %609 = shalt.err (!%p606_p7)
}
 0x1d1   :  { %438 = dma.vmem_to_hbm [thread:$0]  %s436_s19, 128, %s795_s3, [#allocation3]  }
 0x1d2   :  { %610 = dma.done.wait [#allocation3], 128  }
 0x1d3   :  { %611 = vsyncadd [#allocation3], 4294967168 }
 0x1d4   :  { %442 = vsyncpa [#allocation3], 1 }

</bundles_post_ra>
